<compile_context>
chip_gen: v6e
topology: v6e:2x2x1
jax: 0.10.0
libtpu: 0.0.40
codegen_flags: <defaults>
</compile_context>

<pallas_src>
import functools

import jax
import jax.numpy as jnp
from jax.experimental import pallas as pl
from jax.experimental.pallas import tpu as pltpu


def _round_up(x, m):
    return (x + m - 1) // m * m


# ----------------------------------------------------------------------------
# Pallas kernel 1: fused  out = maybe_relu(x @ w + shift)
#   x: (TILE_M, K) bf16    w: (K, N) bf16    shift: (1, N) f32
# BN affine and conv/linear bias are pre-folded into w / shift on the host.
# ----------------------------------------------------------------------------
def _matmul_shift_kernel(x_ref, w_ref, shift_ref, o_ref, *, apply_relu: bool):
    acc = jnp.dot(x_ref[...], w_ref[...], preferred_element_type=jnp.float32)
    acc = acc + shift_ref[...]          # f32 epilogue (free in VALU slots)
    if apply_relu:
        acc = jnp.maximum(acc, 0.0)
    o_ref[...] = acc


def fused_matmul(x, w, shift, *, apply_relu, tile_m=512):
    """out[:M, :N] = maybe_relu(x @ w + shift) with lane-dense padded tiles.

    x: (M, K) f32, w: (K, N) f32, shift: (N,) f32.  K and N are zero-padded to
    multiples of 128 (zero rows/cols are free on the MXU); M is padded to a
    multiple of 16 and, once it exceeds tile_m, tiled along a "parallel" grid
    axis (2 TensorCores on v7x, pipelining + bounded VMEM per block elsewhere).
    Inputs are cast to bf16 for the MXU; accumulation/epilogue stay f32.
    """
    M, K = x.shape
    Kw, N = w.shape
    assert K == Kw
    k_pad = _round_up(K, 128)
    n_pad = _round_up(N, 128)
    if M <= tile_m:
        tm = _round_up(M, 16)
        m_pad = tm
    else:
        tm = tile_m
        m_pad = _round_up(M, tile_m)

    x_p = jnp.pad(x, ((0, m_pad - M), (0, k_pad - K))).astype(jnp.bfloat16)
    w_p = jnp.pad(w, ((0, k_pad - K), (0, n_pad - N))).astype(jnp.bfloat16)
    s_p = jnp.pad(shift.reshape(1, N), ((0, 0), (0, n_pad - N))).astype(jnp.float32)

    out = pl.pallas_call(
        functools.partial(_matmul_shift_kernel, apply_relu=apply_relu),
        out_shape=jax.ShapeDtypeStruct((m_pad, n_pad), jnp.float32),
        grid=(pl.cdiv(m_pad, tm),),
        in_specs=[
            pl.BlockSpec((tm, k_pad), lambda i: (i, 0)),
            pl.BlockSpec((k_pad, n_pad), lambda i: (0, 0)),
            pl.BlockSpec((1, n_pad), lambda i: (0, 0)),
        ],
        out_specs=pl.BlockSpec((tm, n_pad), lambda i: (i, 0)),
        compiler_params=pltpu.CompilerParams(
            dimension_semantics=("parallel",)),
    )(x_p, w_p, s_p)
    return out[:M, :N]


# ----------------------------------------------------------------------------
# Pallas kernel 2: fused FC stack  fc3(relu(fc2(relu(fc1(x)))))
# All three weight matrices are tiny and stay VMEM resident in one call.
# ----------------------------------------------------------------------------
def _fc_stack_kernel(x_ref, w1_ref, b1_ref, w2_ref, b2_ref, w3_ref, b3_ref, o_ref):
    h = jnp.dot(x_ref[...], w1_ref[...], preferred_element_type=jnp.float32)
    h = jnp.maximum(h + b1_ref[...], 0.0)
    h = jnp.dot(h.astype(jnp.bfloat16), w2_ref[...],
                preferred_element_type=jnp.float32)
    h = jnp.maximum(h + b2_ref[...], 0.0)
    h = jnp.dot(h.astype(jnp.bfloat16), w3_ref[...],
                preferred_element_type=jnp.float32)
    o_ref[...] = h + b3_ref[...]


def fused_fc_stack(x, w1, b1, w2, b2, w3, b3):
    """x: (B, F); w_i: (in_i, out_i); b_i: (out_i,).

    Dims are zero-padded to lane-dense multiples of 128 (sublane 16).  Padded
    lanes stay exactly zero through the relu chain (zero inputs x zero weight
    rows + zero bias), so the final slice is exact.
    """
    B, F = x.shape
    _, H1 = w1.shape
    _, H2 = w2.shape
    _, C = w3.shape
    b_pad = _round_up(B, 16)
    f_pad = _round_up(F, 128)
    h1_pad = _round_up(H1, 128)
    h2_pad = _round_up(H2, 128)
    c_pad = _round_up(C, 128)

    x_p = jnp.pad(x, ((0, b_pad - B), (0, f_pad - F))).astype(jnp.bfloat16)
    w1_p = jnp.pad(w1, ((0, f_pad - F), (0, h1_pad - H1))).astype(jnp.bfloat16)
    b1_p = jnp.pad(b1.reshape(1, H1), ((0, 0), (0, h1_pad - H1))).astype(jnp.float32)
    w2_p = jnp.pad(w2, ((0, h1_pad - H1), (0, h2_pad - H2))).astype(jnp.bfloat16)
    b2_p = jnp.pad(b2.reshape(1, H2), ((0, 0), (0, h2_pad - H2))).astype(jnp.float32)
    w3_p = jnp.pad(w3, ((0, h2_pad - H2), (0, c_pad - C))).astype(jnp.bfloat16)
    b3_p = jnp.pad(b3.reshape(1, C), ((0, 0), (0, c_pad - C))).astype(jnp.float32)

    shapes = [(b_pad, f_pad), (f_pad, h1_pad), (1, h1_pad),
              (h1_pad, h2_pad), (1, h2_pad), (h2_pad, c_pad), (1, c_pad)]
    out = pl.pallas_call(
        _fc_stack_kernel,
        out_shape=jax.ShapeDtypeStruct((b_pad, c_pad), jnp.float32),
        grid=(1,),
        in_specs=[pl.BlockSpec(s, lambda i: (0, 0)) for s in shapes],
        out_specs=pl.BlockSpec((b_pad, c_pad), lambda i: (0, 0)),
        compiler_params=pltpu.CompilerParams(
            dimension_semantics=("arbitrary",)),
    )(x_p, w1_p, b1_p, w2_p, b2_p, w3_p, b3_p)
    return out[:B, :C]


# ----------------------------------------------------------------------------
# Channels-last im2col + Conv3d/BN/ReLU wrapper
# ----------------------------------------------------------------------------
def im2col_3d_cl(x, kernel_size, stride):
    """Channels-last im2col.  x: (N, D, H, W, C) -> (N*Do*Ho*Wo, kd*kh*kw*C).

    The patch axis (kz, ky, kx, C) is created directly as the trailing axis, so
    the reshape is a plain flatten with no post-stack transpose of the expanded
    tensor.
    """
    n, d, h, w, c = x.shape
    kd, kh, kw = kernel_size
    sd, sh, sw = stride
    do = (d - kd) // sd + 1
    ho = (h - kh) // sh + 1
    wo = (w - kw) // sw + 1
    slices = []
    for kz in range(kd):
        for ky in range(kh):
            for kx in range(kw):
                slices.append(x[:,
                                kz:kz + sd * do:sd,
                                ky:ky + sh * ho:sh,
                                kx:kx + sw * wo:sw, :])      # (N, Do, Ho, Wo, C)
    p = jnp.stack(slices, axis=4)                             # (N,Do,Ho,Wo,kdhw,C)
    return p.reshape(n * do * ho * wo, kd * kh * kw * c), (n, do, ho, wo)


def conv3d_bn_relu_cl(x_cl, weight, bias, gamma, beta, mean, var, stride, eps=1e-5):
    """Conv3d (valid pad) + eval-mode BatchNorm3d + ReLU, channels-last in/out.

    The BN scale is folded into the weight columns and (bias, BN shift) into a
    single per-channel shift, so the Pallas kernel is just matmul + add + relu.
    """
    cout, cin, kd, kh, kw = weight.shape
    patches, (n, do, ho, wo) = im2col_3d_cl(x_cl, (kd, kh, kw), stride)
    # (Cout, Cin, kd, kh, kw) -> (kd, kh, kw, Cin, Cout): matches patch K order.
    w_mat = jnp.transpose(weight, (2, 3, 4, 1, 0)).reshape(kd * kh * kw * cin, cout)
    scale = gamma / jnp.sqrt(var + eps)
    w_folded = w_mat * scale[None, :]
    shift = (bias - mean) * scale + beta
    out = fused_matmul(patches, w_folded, shift, apply_relu=True)
    return out.reshape(n, do, ho, wo, cout)        # stay channels-last


# ----------------------------------------------------------------------------
# CNN3D forward (eval mode)
# ----------------------------------------------------------------------------
def conv3d_output_size(img_size, padding, kernel_size, stride):
    return tuple(
        (img_size[i] + 2 * padding[i] - (kernel_size[i] - 1) - 1) // stride[i] + 1
        for i in range(3))


def make_params(key, t_dim, img_x, img_y, fc_hidden1, fc_hidden2, num_classes):
    ch1, ch2 = 32, 48
    k1, k2 = (5, 5, 5), (3, 3, 3)
    s1, s2 = (2, 2, 2), (2, 2, 2)
    pd = (0, 0, 0)
    c1_out = conv3d_output_size((t_dim, img_x, img_y), pd, k1, s1)
    c2_out = conv3d_output_size(c1_out, pd, k2, s2)
    flat = ch2 * c2_out[0] * c2_out[1] * c2_out[2]

    ks = jax.random.split(key, 10)
    p = {
        "conv1_w": 0.05 * jax.random.normal(ks[0], (ch1, 1, *k1), jnp.float32),
        "conv1_b": 0.05 * jax.random.normal(ks[1], (ch1,), jnp.float32),
        "bn1_gamma": 1.0 + 0.02 * jax.random.normal(ks[2], (ch1,), jnp.float32),
        "bn1_beta": 0.02 * jax.random.normal(ks[3], (ch1,), jnp.float32),
        "bn1_mean": jnp.zeros((ch1,), jnp.float32),
        "bn1_var": jnp.ones((ch1,), jnp.float32),
        "conv2_w": 0.05 * jax.random.normal(ks[4], (ch2, ch1, *k2), jnp.float32),
        "conv2_b": 0.05 * jax.random.normal(ks[5], (ch2,), jnp.float32),
        "bn2_gamma": 1.0 + 0.02 * jax.random.normal(ks[6], (ch2,), jnp.float32),
        "bn2_beta": 0.02 * jax.random.normal(ks[7], (ch2,), jnp.float32),
        "bn2_mean": jnp.zeros((ch2,), jnp.float32),
        "bn2_var": jnp.ones((ch2,), jnp.float32),
        "fc1_w": 0.05 * jax.random.normal(ks[8], (fc_hidden1, flat), jnp.float32),
        "fc1_b": jnp.zeros((fc_hidden1,), jnp.float32),
        "fc2_w": 0.05 * jax.random.normal(ks[9], (fc_hidden2, fc_hidden1), jnp.float32),
        "fc2_b": jnp.zeros((fc_hidden2,), jnp.float32),
        "fc3_w": 0.05 * jax.random.normal(jax.random.fold_in(key, 99),
                                          (num_classes, fc_hidden2), jnp.float32),
        "fc3_b": jnp.zeros((num_classes,), jnp.float32),
    }
    meta = dict(s1=s1, s2=s2)
    return p, meta


def cnn3d_forward(x_ncdhw, p, meta):
    # One-time layout change: NCDHW -> channels-last NDHWC.
    x = jnp.transpose(x_ncdhw, (0, 2, 3, 4, 1))
    # conv1 + bn1 + relu  (Dropout3d = identity in eval mode)
    x = conv3d_bn_relu_cl(x, p["conv1_w"], p["conv1_b"], p["bn1_gamma"],
                          p["bn1_beta"], p["bn1_mean"], p["bn1_var"], meta["s1"])
    # conv2 + bn2 + relu
    x = conv3d_bn_relu_cl(x, p["conv2_w"], p["conv2_b"], p["bn2_gamma"],
                          p["bn2_beta"], p["bn2_mean"], p["bn2_var"], meta["s2"])
    n, d2, h2, w2, c2 = x.shape
    x = x.reshape(n, d2 * h2 * w2 * c2)            # channels-last flatten (d,h,w,c)
    # Permute fc1 columns from PyTorch's (c,d,h,w) flatten order to (d,h,w,c).
    # Static parameter transform; constant-folded once under jit.
    fc1_w_cl = (p["fc1_w"].reshape(-1, c2, d2, h2, w2)
                .transpose(0, 2, 3, 4, 1)
                .reshape(p["fc1_w"].shape[0], -1))
    # F.dropout is identity in eval mode.
    return fused_fc_stack(x,
                          fc1_w_cl.T, p["fc1_b"],
                          p["fc2_w"].T, p["fc2_b"],
                          p["fc3_w"].T, p["fc3_b"])


if __name__ == "__main__":
    # Small, self-consistent shapes: t_dim=16, img 16x16, 1 input channel.
    batch, t_dim, img_x, img_y = 2, 16, 16, 16
    fc_hidden1, fc_hidden2, num_classes = 32, 16, 8

    key = jax.random.PRNGKey(0)
    k_in, k_p = jax.random.split(key)
    x = jax.random.normal(k_in, (batch, 1, t_dim, img_x, img_y), jnp.float32)

    params, meta = make_params(k_p, t_dim, img_x, img_y,
                               fc_hidden1, fc_hidden2, num_classes)

    fwd = jax.jit(functools.partial(cnn3d_forward, meta=meta))
    out = jax.block_until_ready(fwd(x, params))
    assert out.shape == (batch, num_classes), out.shape
    assert jnp.all(jnp.isfinite(out))
    print("KERNEL_OK")
</pallas_src>

<mosaic_0001>
module attributes {stable_mosaic.version = 11 : i64} {
  func.func @_matmul_shift_kernel(%arg0: i32, %arg1: memref<432x128xbf16, #tpu.memory_space<vmem>>, %arg2: memref<128x128xbf16, #tpu.memory_space<vmem>>, %arg3: memref<1x128xf32, #tpu.memory_space<vmem>>, %arg4: memref<432x128xf32, #tpu.memory_space<vmem>>) attributes {dimension_semantics = [#tpu.dimension_semantics<parallel>], iteration_bounds = array<i64: 1>, scalar_prefetch = 0 : i64, scratch_operands = 0 : i64, tpu.core_type = #tpu.core_type<tc>, window_params = [{transform_indices = @transform_0, window_bounds = array<i64: 432, 128>}, {pipeline_mode = #tpu.pipeline_mode<synchronous>, transform_indices = @transform_1, window_bounds = array<i64: 128, 128>}, {pipeline_mode = #tpu.pipeline_mode<synchronous>, transform_indices = @transform_2, window_bounds = array<i64: 1, 128>}, {transform_indices = @transform_3, window_bounds = array<i64: 432, 128>}]} {
    %c0 = arith.constant 0 : index
    %c0_0 = arith.constant 0 : index
    %0 = vector.load %arg1[%c0, %c0_0] : memref<432x128xbf16, #tpu.memory_space<vmem>>, vector<432x128xbf16>
    %c0_1 = arith.constant 0 : index
    %c0_2 = arith.constant 0 : index
    %1 = vector.load %arg2[%c0_1, %c0_2] : memref<128x128xbf16, #tpu.memory_space<vmem>>, vector<128x128xbf16>
    %cst = arith.constant dense<0.000000e+00> : vector<432x128xf32>
    %2 = tpu.matmul %0, %1, %cst {dimension_numbers = #tpu.dot_dimension_numbers<[1], [0], [0], [1], [0, 0, 1, 1], [], []>} : vector<432x128xbf16>, vector<128x128xbf16>, vector<432x128xf32> -> vector<432x128xf32>
    %c0_3 = arith.constant 0 : index
    %c0_4 = arith.constant 0 : index
    %3 = vector.load %arg3[%c0_3, %c0_4] : memref<1x128xf32, #tpu.memory_space<vmem>>, vector<1x128xf32>
    %4 = vector.broadcast %3 : vector<1x128xf32> to vector<432x128xf32>
    %5 = arith.addf %2, %4 : vector<432x128xf32>
    %cst_5 = arith.constant 0.000000e+00 : f32
    %6 = vector.broadcast %cst_5 : f32 to vector<432x128xf32>
    %7 = arith.maximumf %5, %6 : vector<432x128xf32>
    %c0_6 = arith.constant 0 : index
    %c0_7 = arith.constant 0 : index
    %8 = vector.load %arg4[%c0_6, %c0_7] : memref<432x128xf32, #tpu.memory_space<vmem>>, vector<432x128xf32>
    tpu.vector_store %arg4[%c0_6, %c0_7], %7 {strides = array<i32>} : memref<432x128xf32, #tpu.memory_space<vmem>>, vector<432x128xf32>,
    return
  }
  func.func @transform_0(%arg0: i32) -> (i32, i32) {
    %c0_i32 = arith.constant 0 : i32
    %c0_i32_0 = arith.constant 0 : i32
    return %arg0, %c0_i32 : i32, i32
  }
  func.func @transform_1(%arg0: i32) -> (i32, i32) {
    %c0_i32 = arith.constant 0 : i32
    %c0_i32_0 = arith.constant 0 : i32
    %c0_i32_1 = arith.constant 0 : i32
    return %c0_i32, %c0_i32_0 : i32, i32
  }
  func.func @transform_2(%arg0: i32) -> (i32, i32) {
    %c0_i32 = arith.constant 0 : i32
    %c0_i32_0 = arith.constant 0 : i32
    %c0_i32_1 = arith.constant 0 : i32
    return %c0_i32, %c0_i32_0 : i32, i32
  }
  func.func @transform_3(%arg0: i32) -> (i32, i32) {
    %c0_i32 = arith.constant 0 : i32
    %c0_i32_0 = arith.constant 0 : i32
    return %arg0, %c0_i32 : i32, i32
  }
}

module attributes {stable_mosaic.version = 11 : i64} {
  func.func @_matmul_shift_kernel(%arg0: i32, %arg1: memref<16x896xbf16, #tpu.memory_space<vmem>>, %arg2: memref<896x128xbf16, #tpu.memory_space<vmem>>, %arg3: memref<1x128xf32, #tpu.memory_space<vmem>>, %arg4: memref<16x128xf32, #tpu.memory_space<vmem>>) attributes {dimension_semantics = [#tpu.dimension_semantics<parallel>], iteration_bounds = array<i64: 1>, scalar_prefetch = 0 : i64, scratch_operands = 0 : i64, tpu.core_type = #tpu.core_type<tc>, window_params = [{transform_indices = @transform_0, window_bounds = array<i64: 16, 896>}, {pipeline_mode = #tpu.pipeline_mode<synchronous>, transform_indices = @transform_1, window_bounds = array<i64: 896, 128>}, {pipeline_mode = #tpu.pipeline_mode<synchronous>, transform_indices = @transform_2, window_bounds = array<i64: 1, 128>}, {transform_indices = @transform_3, window_bounds = array<i64: 16, 128>}]} {
    %c0 = arith.constant 0 : index
    %c0_0 = arith.constant 0 : index
    %0 = vector.load %arg1[%c0, %c0_0] : memref<16x896xbf16, #tpu.memory_space<vmem>>, vector<16x896xbf16>
    %c0_1 = arith.constant 0 : index
    %c0_2 = arith.constant 0 : index
    %1 = vector.load %arg2[%c0_1, %c0_2] : memref<896x128xbf16, #tpu.memory_space<vmem>>, vector<896x128xbf16>
    %cst = arith.constant dense<0.000000e+00> : vector<16x128xf32>
    %2 = tpu.matmul %0, %1, %cst {dimension_numbers = #tpu.dot_dimension_numbers<[1], [0], [0], [1], [0, 0, 1, 1], [], []>} : vector<16x896xbf16>, vector<896x128xbf16>, vector<16x128xf32> -> vector<16x128xf32>
    %c0_3 = arith.constant 0 : index
    %c0_4 = arith.constant 0 : index
    %3 = vector.load %arg3[%c0_3, %c0_4] : memref<1x128xf32, #tpu.memory_space<vmem>>, vector<1x128xf32>
    %4 = vector.broadcast %3 : vector<1x128xf32> to vector<16x128xf32>
    %5 = arith.addf %2, %4 : vector<16x128xf32>
    %cst_5 = arith.constant 0.000000e+00 : f32
    %6 = vector.broadcast %cst_5 : f32 to vector<16x128xf32>
    %7 = arith.maximumf %5, %6 : vector<16x128xf32>
    %c0_6 = arith.constant 0 : index
    %c0_7 = arith.constant 0 : index
    %8 = vector.load %arg4[%c0_6, %c0_7] : memref<16x128xf32, #tpu.memory_space<vmem>>, vector<16x128xf32>
    tpu.vector_store %arg4[%c0_6, %c0_7], %7 {strides = array<i32>} : memref<16x128xf32, #tpu.memory_space<vmem>>, vector<16x128xf32>,
    return
  }
  func.func @transform_0(%arg0: i32) -> (i32, i32) {
    %c0_i32 = arith.constant 0 : i32
    %c0_i32_0 = arith.constant 0 : i32
    return %arg0, %c0_i32 : i32, i32
  }
  func.func @transform_1(%arg0: i32) -> (i32, i32) {
    %c0_i32 = arith.constant 0 : i32
    %c0_i32_0 = arith.constant 0 : i32
    %c0_i32_1 = arith.constant 0 : i32
    return %c0_i32, %c0_i32_0 : i32, i32
  }
  func.func @transform_2(%arg0: i32) -> (i32, i32) {
    %c0_i32 = arith.constant 0 : i32
    %c0_i32_0 = arith.constant 0 : i32
    %c0_i32_1 = arith.constant 0 : i32
    return %c0_i32, %c0_i32_0 : i32, i32
  }
  func.func @transform_3(%arg0: i32) -> (i32, i32) {
    %c0_i32 = arith.constant 0 : i32
    %c0_i32_0 = arith.constant 0 : i32
    return %arg0, %c0_i32 : i32, i32
  }
}

module attributes {stable_mosaic.version = 11 : i64} {
  func.func @_fc_stack_kernel(%arg0: i32, %arg1: memref<16x384xbf16, #tpu.memory_space<vmem>>, %arg2: memref<384x128xbf16, #tpu.memory_space<vmem>>, %arg3: memref<1x128xf32, #tpu.memory_space<vmem>>, %arg4: memref<128x128xbf16, #tpu.memory_space<vmem>>, %arg5: memref<1x128xf32, #tpu.memory_space<vmem>>, %arg6: memref<128x128xbf16, #tpu.memory_space<vmem>>, %arg7: memref<1x128xf32, #tpu.memory_space<vmem>>, %arg8: memref<16x128xf32, #tpu.memory_space<vmem>>) attributes {dimension_semantics = [#tpu.dimension_semantics<arbitrary>], iteration_bounds = array<i64: 1>, scalar_prefetch = 0 : i64, scratch_operands = 0 : i64, tpu.core_type = #tpu.core_type<tc>, window_params = [{pipeline_mode = #tpu.pipeline_mode<synchronous>, transform_indices = @transform_0, window_bounds = array<i64: 16, 384>}, {pipeline_mode = #tpu.pipeline_mode<synchronous>, transform_indices = @transform_1, window_bounds = array<i64: 384, 128>}, {pipeline_mode = #tpu.pipeline_mode<synchronous>, transform_indices = @transform_2, window_bounds = array<i64: 1, 128>}, {pipeline_mode = #tpu.pipeline_mode<synchronous>, transform_indices = @transform_3, window_bounds = array<i64: 128, 128>}, {pipeline_mode = #tpu.pipeline_mode<synchronous>, transform_indices = @transform_4, window_bounds = array<i64: 1, 128>}, {pipeline_mode = #tpu.pipeline_mode<synchronous>, transform_indices = @transform_5, window_bounds = array<i64: 128, 128>}, {pipeline_mode = #tpu.pipeline_mode<synchronous>, transform_indices = @transform_6, window_bounds = array<i64: 1, 128>}, {pipeline_mode = #tpu.pipeline_mode<synchronous>, transform_indices = @transform_7, window_bounds = array<i64: 16, 128>}]} {
    %c0 = arith.constant 0 : index
    %c0_0 = arith.constant 0 : index
    %0 = vector.load %arg1[%c0, %c0_0] : memref<16x384xbf16, #tpu.memory_space<vmem>>, vector<16x384xbf16>
    %c0_1 = arith.constant 0 : index
    %c0_2 = arith.constant 0 : index
    %1 = vector.load %arg2[%c0_1, %c0_2] : memref<384x128xbf16, #tpu.memory_space<vmem>>, vector<384x128xbf16>
    %cst = arith.constant dense<0.000000e+00> : vector<16x128xf32>
    %2 = tpu.matmul %0, %1, %cst {dimension_numbers = #tpu.dot_dimension_numbers<[1], [0], [0], [1], [0, 0, 1, 1], [], []>} : vector<16x384xbf16>, vector<384x128xbf16>, vector<16x128xf32> -> vector<16x128xf32>
    %c0_3 = arith.constant 0 : index
    %c0_4 = arith.constant 0 : index
    %3 = vector.load %arg3[%c0_3, %c0_4] : memref<1x128xf32, #tpu.memory_space<vmem>>, vector<1x128xf32>
    %4 = vector.broadcast %3 : vector<1x128xf32> to vector<16x128xf32>
    %5 = arith.addf %2, %4 : vector<16x128xf32>
    %cst_5 = arith.constant 0.000000e+00 : f32
    %6 = vector.broadcast %cst_5 : f32 to vector<16x128xf32>
    %7 = arith.maximumf %5, %6 : vector<16x128xf32>
    %8 = arith.truncf %7 : vector<16x128xf32> to vector<16x128xbf16>
    %c0_6 = arith.constant 0 : index
    %c0_7 = arith.constant 0 : index
    %9 = vector.load %arg4[%c0_6, %c0_7] : memref<128x128xbf16, #tpu.memory_space<vmem>>, vector<128x128xbf16>
    %cst_8 = arith.constant dense<0.000000e+00> : vector<16x128xf32>
    %10 = tpu.matmul %8, %9, %cst_8 {dimension_numbers = #tpu.dot_dimension_numbers<[1], [0], [0], [1], [0, 0, 1, 1], [], []>} : vector<16x128xbf16>, vector<128x128xbf16>, vector<16x128xf32> -> vector<16x128xf32>
    %c0_9 = arith.constant 0 : index
    %c0_10 = arith.constant 0 : index
    %11 = vector.load %arg5[%c0_9, %c0_10] : memref<1x128xf32, #tpu.memory_space<vmem>>, vector<1x128xf32>
    %12 = vector.broadcast %11 : vector<1x128xf32> to vector<16x128xf32>
    %13 = arith.addf %10, %12 : vector<16x128xf32>
    %cst_11 = arith.constant 0.000000e+00 : f32
    %14 = vector.broadcast %cst_11 : f32 to vector<16x128xf32>
    %15 = arith.maximumf %13, %14 : vector<16x128xf32>
    %16 = arith.truncf %15 : vector<16x128xf32> to vector<16x128xbf16>
    %c0_12 = arith.constant 0 : index
    %c0_13 = arith.constant 0 : index
    %17 = vector.load %arg6[%c0_12, %c0_13] : memref<128x128xbf16, #tpu.memory_space<vmem>>, vector<128x128xbf16>
    %cst_14 = arith.constant dense<0.000000e+00> : vector<16x128xf32>
    %18 = tpu.matmul %16, %17, %cst_14 {dimension_numbers = #tpu.dot_dimension_numbers<[1], [0], [0], [1], [0, 0, 1, 1], [], []>} : vector<16x128xbf16>, vector<128x128xbf16>, vector<16x128xf32> -> vector<16x128xf32>
    %c0_15 = arith.constant 0 : index
    %c0_16 = arith.constant 0 : index
    %19 = vector.load %arg7[%c0_15, %c0_16] : memref<1x128xf32, #tpu.memory_space<vmem>>, vector<1x128xf32>
    %20 = vector.broadcast %19 : vector<1x128xf32> to vector<16x128xf32>
    %21 = arith.addf %18, %20 : vector<16x128xf32>
    %c0_17 = arith.constant 0 : index
    %c0_18 = arith.constant 0 : index
    %22 = vector.load %arg8[%c0_17, %c0_18] : memref<16x128xf32, #tpu.memory_space<vmem>>, vector<16x128xf32>
    tpu.vector_store %arg8[%c0_17, %c0_18], %21 {strides = array<i32>} : memref<16x128xf32, #tpu.memory_space<vmem>>, vector<16x128xf32>,
    return
  }
  func.func @transform_0(%arg0: i32) -> (i32, i32) {
    %c0_i32 = arith.constant 0 : i32
    %c0_i32_0 = arith.constant 0 : i32
    %c0_i32_1 = arith.constant 0 : i32
    return %c0_i32, %c0_i32_0 : i32, i32
  }
  func.func @transform_1(%arg0: i32) -> (i32, i32) {
    %c0_i32 = arith.constant 0 : i32
    %c0_i32_0 = arith.constant 0 : i32
    %c0_i32_1 = arith.constant 0 : i32
    return %c0_i32, %c0_i32_0 : i32, i32
  }
  func.func @transform_2(%arg0: i32) -> (i32, i32) {
    %c0_i32 = arith.constant 0 : i32
    %c0_i32_0 = arith.constant 0 : i32
    %c0_i32_1 = arith.constant 0 : i32
    return %c0_i32, %c0_i32_0 : i32, i32
  }
  func.func @transform_3(%arg0: i32) -> (i32, i32) {
    %c0_i32 = arith.constant 0 : i32
    %c0_i32_0 = arith.constant 0 : i32
    %c0_i32_1 = arith.constant 0 : i32
    return %c0_i32, %c0_i32_0 : i32, i32
  }
  func.func @transform_4(%arg0: i32) -> (i32, i32) {
    %c0_i32 = arith.constant 0 : i32
    %c0_i32_0 = arith.constant 0 : i32
    %c0_i32_1 = arith.constant 0 : i32
    return %c0_i32, %c0_i32_0 : i32, i32
  }
  func.func @transform_5(%arg0: i32) -> (i32, i32) {
    %c0_i32 = arith.constant 0 : i32
    %c0_i32_0 = arith.constant 0 : i32
    %c0_i32_1 = arith.constant 0 : i32
    return %c0_i32, %c0_i32_0 : i32, i32
  }
  func.func @transform_6(%arg0: i32) -> (i32, i32) {
    %c0_i32 = arith.constant 0 : i32
    %c0_i32_0 = arith.constant 0 : i32
    %c0_i32_1 = arith.constant 0 : i32
    return %c0_i32, %c0_i32_0 : i32, i32
  }
  func.func @transform_7(%arg0: i32) -> (i32, i32) {
    %c0_i32 = arith.constant 0 : i32
    %c0_i32_0 = arith.constant 0 : i32
    %c0_i32_1 = arith.constant 0 : i32
    return %c0_i32, %c0_i32_0 : i32, i32
  }
}

</mosaic_0001>

<bundles_post_ra>
// kernel: cnn3d_forward.3
= control target key start
LH: loop header
LB: loop body
LE: loop exit
PB: predicated region body
PF: predicated region fallthrough
CT: control target
= control target key end

     0   :  { %v911_v0 = vmov 0.0   ;;  %vm912_vm0 = vmmov 0   ;;  %s1329_s1 = inlined_call_operand.vmem [shape: bf16[128,128], index: 1, kind: input, shape index: {}]   ;;  %s1330_s0 = inlined_call_operand.vmem [shape: bf16[432,128], index: 0, kind: input, shape index: {}]   ;;  %s1331_s2 = inlined_call_operand.vmem [shape: f32[1,128], index: 2, kind: input, shape index: {}]   ;;  %s1332_s3 = inlined_call_operand.vmem [shape: f32[432,128], index: 3, kind: output, shape index: {}]  }
   0x1   :  { %734 = vmatprep.subr.bf16.mxu0 %v911_v0  ;;  %v876_v1 = vld [vmem:[%s1329_s1 + $0x38] sm:$0xff]   ;;  %858 = vmatprep.subr.bf16.mxu1 %v911_v0  ;;  %v877_v2 = vld [vmem:[%s1329_s1 + $0x30] sm:$0xff]   ;;  %v878_v3 = vld [vmem:[%s1329_s1 + $0x28] sm:$0xff]  }
   0x2   :  { %750 = vmatprep.mubr.msk.bf16.mxu0 %vm912_vm0, %v911_v0  ;;  %806 = vmatprep.mubr.msk.bf16.mxu1 %vm912_vm0, %v911_v0  ;;  %v879_v4 = vld [vmem:[%s1329_s1 + $0x20] sm:$0xff]   ;;  %v880_v5 = vld [vmem:[%s1329_s1 + $0x18] sm:$0xff]   ;;  %v881_v6 = vld [vmem:[%s1329_s1 + $0x10] sm:$0xff]  }
   0x3   :  { %735 = vmatpush3.bf16.msra.mxu0 %v876_v1  ;;  %866 = vmatpush3.bf16.msra.mxu1 %v876_v1  ;;  %v882_v7 = vld [vmem:[%s1329_s1 + $0x8] sm:$0xff]   ;;  %v883_v8 = vld [vmem:[%s1329_s1] sm:$0xff]   ;;  %v885_v10 = vld [vmem:[%s1330_s0 + $0x70] sm:$0xff]  }
   0x4   :  { %736 = vmatprep.subr.bf16.mxu0 %v911_v0  ;;  %859 = vmatprep.subr.bf16.mxu1 %v911_v0  ;;  %v884_v9 = vld [vmem:[%s1330_s0] sm:$0xff]   ;;  %v886_v11 = vld [vmem:[%s1330_s0 + $0x8] sm:$0xff]   ;;  %v887_v12 = vld [vmem:[%s1330_s0 + $0x78] sm:$0xff]  }
   0x5   :  { %v888_v13 = vld [vmem:[%s1330_s0 + $0x10] sm:$0xff]   ;;  %v889_v14 = vld [vmem:[%s1330_s0 + $0x80] sm:$0xff]   ;;  %v890_v15 = vld [vmem:[%s1330_s0 + $0x18] sm:$0xff]  }
   0x6   :  { %v891_v16 = vld [vmem:[%s1330_s0 + $0x88] sm:$0xff]   ;;  %v892_v17 = vld [vmem:[%s1330_s0 + $0x20] sm:$0xff]   ;;  %v893_v18 = vld [vmem:[%s1330_s0 + $0x90] sm:$0xff]  }
   0x7   :  { %737 = vmatpush3.bf16.msra.mxu0 %v877_v2  ;;  %867 = vmatpush3.bf16.msra.mxu1 %v877_v2  ;;  %v894_v19 = vld [vmem:[%s1330_s0 + $0x28] sm:$0xff]   ;;  %v895_v20 = vld [vmem:[%s1330_s0 + $0x98] sm:$0xff]   ;;  %v896_v21 = vld [vmem:[%s1330_s0 + $0x30] sm:$0xff]  }
   0x8   :  { %738 = vmatprep.subr.bf16.mxu0 %v911_v0  ;;  %860 = vmatprep.subr.bf16.mxu1 %v911_v0  ;;  %v897_v22 = vld [vmem:[%s1330_s0 + $0xa0] sm:$0xff]   ;;  %v898_v23 = vld [vmem:[%s1330_s0 + $0x38] sm:$0xff]   ;;  %v899_v24 = vld [vmem:[%s1330_s0 + $0xa8] sm:$0xff]  }
   0x9   :  { %v900_v25 = vld [vmem:[%s1330_s0 + $0x40] sm:$0xff]   ;;  %v901_v26 = vld [vmem:[%s1330_s0 + $0xb0] sm:$0xff]   ;;  %v902_v27 = vld [vmem:[%s1330_s0 + $0x48] sm:$0xff]  }
   0xa   :  { %v903_v28 = vld [vmem:[%s1330_s0 + $0xb8] sm:$0xff]   ;;  %v904_v29 = vld [vmem:[%s1330_s0 + $0x50] sm:$0xff]   ;;  %v905_v30 = vld [vmem:[%s1330_s0 + $0xc0] sm:$0xff]  }
   0xb   :  { %739 = vmatpush3.bf16.msra.mxu0 %v878_v3  ;;  %868 = vmatpush3.bf16.msra.mxu1 %v878_v3  ;;  %v906_v31 = vld [vmem:[%s1330_s0 + $0x58] sm:$0xff]   ;;  %v907_v32 = vld [vmem:[%s1330_s0 + $0xc8] sm:$0xff]   ;;  %v908_v33 = vld [vmem:[%s1330_s0 + $0x60] sm:$0xff]  }
   0xc   :  { %740 = vmatprep.subr.bf16.mxu0 %v911_v0  ;;  %861 = vmatprep.subr.bf16.mxu1 %v911_v0  ;;  %v909_v34 = vld [vmem:[%s1330_s0 + $0xd0] sm:$0xff]   ;;  %v910_v35 = vld [vmem:[%s1330_s0 + $0x68] sm:$0xff]   ;;  %v1111_v36 = vld [vmem:[%s1331_s2] ss:$0 sm:$0xff] }
   0xf   :  { %741 = vmatpush3.bf16.msra.mxu0 %v879_v4  ;;  %869 = vmatpush3.bf16.msra.mxu1 %v879_v4 }
  0x10   :  { %742 = vmatprep.subr.bf16.mxu0 %v911_v0  ;;  %862 = vmatprep.subr.bf16.mxu1 %v911_v0 }
  0x13   :  { %743 = vmatpush3.bf16.msra.mxu0 %v880_v5  ;;  %870 = vmatpush3.bf16.msra.mxu1 %v880_v5 }
  0x14   :  { %744 = vmatprep.subr.bf16.mxu0 %v911_v0  ;;  %863 = vmatprep.subr.bf16.mxu1 %v911_v0 }
  0x17   :  { %745 = vmatpush3.bf16.msra.mxu0 %v881_v6  ;;  %871 = vmatpush3.bf16.msra.mxu1 %v881_v6 }
  0x18   :  { %746 = vmatprep.subr.bf16.mxu0 %v911_v0  ;;  %864 = vmatprep.subr.bf16.mxu1 %v911_v0 }
  0x1b   :  { %747 = vmatpush3.bf16.msra.mxu0 %v882_v7  ;;  %872 = vmatpush3.bf16.msra.mxu1 %v882_v7 }
  0x1c   :  { %748 = vmatprep.subr.bf16.mxu0 %v911_v0  ;;  %865 = vmatprep.subr.bf16.mxu1 %v911_v0 }
  0x1f   :  { %749 = vmatpush3.bf16.msra.mxu0 %v883_v8  ;;  %873 = vmatpush3.bf16.msra.mxu1 %v883_v8 }
  0x22   :  { %751 = vmatmul.mubr.bf16.vlgmr.msra.gmra.mxu0 %v884_v9  ;;  %807 = vmatmul.mubr.bf16.vlgmr.msra.gmra.mxu1 %v885_v10 }
  0x23   :  { %754 = vmatprep.mubr.msk.bf16.mxu0 %vm912_vm0, %v911_v0  ;;  %810 = vmatprep.mubr.msk.bf16.mxu1 %vm912_vm0, %v911_v0 }
  0x2a   :  { %755 = vmatmul.mubr.bf16.gmra.mxu0 %v886_v11  ;;  %811 = vmatmul.mubr.bf16.gmra.mxu1 %v887_v12 }
  0x2b   :  { %758 = vmatprep.mubr.msk.bf16.mxu0 %vm912_vm0, %v911_v0  ;;  %814 = vmatprep.mubr.msk.bf16.mxu1 %vm912_vm0, %v911_v0 }
  0x32   :  { %759 = vmatmul.mubr.bf16.gmra.mxu0 %v888_v13  ;;  %815 = vmatmul.mubr.bf16.gmra.mxu1 %v889_v14 }
  0x33   :  { %762 = vmatprep.mubr.msk.bf16.mxu0 %vm912_vm0, %v911_v0  ;;  %818 = vmatprep.mubr.msk.bf16.mxu1 %vm912_vm0, %v911_v0 }
  0x3a   :  { %763 = vmatmul.mubr.bf16.gmra.mxu0 %v890_v15  ;;  %819 = vmatmul.mubr.bf16.gmra.mxu1 %v891_v16 }
  0x3b   :  { %766 = vmatprep.mubr.msk.bf16.mxu0 %vm912_vm0, %v911_v0  ;;  %822 = vmatprep.mubr.msk.bf16.mxu1 %vm912_vm0, %v911_v0 }
  0x42   :  { %767 = vmatmul.mubr.bf16.gmra.mxu0 %v892_v17  ;;  %823 = vmatmul.mubr.bf16.gmra.mxu1 %v893_v18 }
  0x43   :  { %770 = vmatprep.mubr.msk.bf16.mxu0 %vm912_vm0, %v911_v0  ;;  %826 = vmatprep.mubr.msk.bf16.mxu1 %vm912_vm0, %v911_v0 }
  0x4a   :  { %771 = vmatmul.mubr.bf16.gmra.mxu0 %v894_v19  ;;  %827 = vmatmul.mubr.bf16.gmra.mxu1 %v895_v20 }
  0x4b   :  { %774 = vmatprep.mubr.msk.bf16.mxu0 %vm912_vm0, %v911_v0  ;;  %830 = vmatprep.mubr.msk.bf16.mxu1 %vm912_vm0, %v911_v0 }
  0x52   :  { %775 = vmatmul.mubr.bf16.gmra.mxu0 %v896_v21  ;;  %831 = vmatmul.mubr.bf16.gmra.mxu1 %v897_v22 }
  0x53   :  { %778 = vmatprep.mubr.msk.bf16.mxu0 %vm912_vm0, %v911_v0  ;;  %834 = vmatprep.mubr.msk.bf16.mxu1 %vm912_vm0, %v911_v0 }
  0x5a   :  { %779 = vmatmul.mubr.bf16.gmra.mxu0 %v898_v23  ;;  %835 = vmatmul.mubr.bf16.gmra.mxu1 %v899_v24 }
  0x5b   :  { %782 = vmatprep.mubr.msk.bf16.mxu0 %vm912_vm0, %v911_v0  ;;  %838 = vmatprep.mubr.msk.bf16.mxu1 %vm912_vm0, %v911_v0 }
  0x62   :  { %783 = vmatmul.mubr.bf16.gmra.mxu0 %v900_v25  ;;  %839 = vmatmul.mubr.bf16.gmra.mxu1 %v901_v26 }
  0x63   :  { %786 = vmatprep.mubr.msk.bf16.mxu0 %vm912_vm0, %v911_v0  ;;  %842 = vmatprep.mubr.msk.bf16.mxu1 %vm912_vm0, %v911_v0 }
  0x6a   :  { %787 = vmatmul.mubr.bf16.gmra.mxu0 %v902_v27  ;;  %843 = vmatmul.mubr.bf16.gmra.mxu1 %v903_v28 }
  0x6b   :  { %790 = vmatprep.mubr.msk.bf16.mxu0 %vm912_vm0, %v911_v0  ;;  %846 = vmatprep.mubr.msk.bf16.mxu1 %vm912_vm0, %v911_v0 }
  0x72   :  { %791 = vmatmul.mubr.bf16.gmra.mxu0 %v904_v29  ;;  %847 = vmatmul.mubr.bf16.gmra.mxu1 %v905_v30 }
  0x73   :  { %794 = vmatprep.mubr.msk.bf16.mxu0 %vm912_vm0, %v911_v0  ;;  %850 = vmatprep.mubr.msk.bf16.mxu1 %vm912_vm0, %v911_v0 }
  0x7a   :  { %795 = vmatmul.mubr.bf16.gmra.mxu0 %v906_v31  ;;  %851 = vmatmul.mubr.bf16.gmra.mxu1 %v907_v32 }
  0x7b   :  { %798 = vmatprep.mubr.msk.bf16.mxu0 %vm912_vm0, %v911_v0  ;;  %854 = vmatprep.mubr.msk.bf16.mxu1 %vm912_vm0, %v911_v0 }
  0x82   :  { %799 = vmatmul.mubr.bf16.gmra.mxu0 %v908_v33  ;;  %855 = vmatmul.mubr.bf16.gmra.mxu1 %v909_v34 }
  0x83   :  { %802 = vmatprep.mubr.msk.bf16.mxu0 %vm912_vm0, %v911_v0 }
  0x8a   :  { %803 = vmatmul.mubr.bf16.gmra.mxu0 %v910_v35 }
  0xe2   :  { %v336_v37 = vpop.f32.mrf.mxu0  ;;  %v448_v38 = vpop.f32.mrf.mxu1 }
  0xe3   :  { %v337_v39 = vadd.f32 %v1111_v36, %v336_v37  ;;  %v449_v40 = vadd.f32 %v1111_v36, %v448_v38 }
  0xe4   :  { %v752_v41 = vpop.f32.mrf.mxu0  ;;  %v808_v42 = vpop.f32.mrf.mxu1 }
  0xe5   :  { %v551_v43 = vmax.f32 %v337_v39, 0.0  ;;  %v579_v44 = vmax.f32 %v449_v40, 0.0 }
  0xe6   :  { %v339_v45 = vpop.f32.mrf.mxu0  ;;  %v451_v46 = vpop.f32.mrf.mxu1 }
  0xe7   :  { %605 = vst [vmem:[%s1332_s3] sm:$0xff] %v551_v43  ;;  %633 = vst [vmem:[%s1332_s3 + $0xe0] sm:$0xff] %v579_v44  ;;  %v340_v47 = vadd.f32 %v1111_v36, %v339_v45  ;;  %v452_v48 = vadd.f32 %v1111_v36, %v451_v46 }
  0xe8   :  { %v753_v49 = vpop.f32.mrf.mxu0  ;;  %v809_v50 = vpop.f32.mrf.mxu1 }
  0xe9   :  { %v552_v51 = vmax.f32 %v340_v47, 0.0  ;;  %v580_v52 = vmax.f32 %v452_v48, 0.0 }
  0xea   :  { %v344_v53 = vpop.f32.mrf.mxu0  ;;  %v456_v54 = vpop.f32.mrf.mxu1 }
  0xeb   :  { %606 = vst [vmem:[%s1332_s3 + $0x8] sm:$0xff] %v552_v51  ;;  %634 = vst [vmem:[%s1332_s3 + $0xe8] sm:$0xff] %v580_v52  ;;  %v345_v55 = vadd.f32 %v1111_v36, %v344_v53  ;;  %v457_v56 = vadd.f32 %v1111_v36, %v456_v54 }
  0xec   :  { %v756_v57 = vpop.f32.mrf.mxu0  ;;  %v812_v58 = vpop.f32.mrf.mxu1 }
  0xed   :  { %v553_v59 = vmax.f32 %v345_v55, 0.0  ;;  %v581_v60 = vmax.f32 %v457_v56, 0.0 }
  0xee   :  { %v347_v61 = vpop.f32.mrf.mxu0  ;;  %v459_v62 = vpop.f32.mrf.mxu1 }
  0xef   :  { %607 = vst [vmem:[%s1332_s3 + $0x10] sm:$0xff] %v553_v59  ;;  %635 = vst [vmem:[%s1332_s3 + $0xf0] sm:$0xff] %v581_v60  ;;  %v348_v63 = vadd.f32 %v1111_v36, %v347_v61  ;;  %v460_v0 = vadd.f32 %v1111_v36, %v459_v62 }
  0xf0   :  { %v757_v1 = vpop.f32.mrf.mxu0  ;;  %v813_v2 = vpop.f32.mrf.mxu1 }
  0xf1   :  { %v554_v3 = vmax.f32 %v348_v63, 0.0  ;;  %v582_v4 = vmax.f32 %v460_v0, 0.0 }
  0xf2   :  { %v352_v5 = vpop.f32.mrf.mxu0  ;;  %v464_v6 = vpop.f32.mrf.mxu1 }
  0xf3   :  { %608 = vst [vmem:[%s1332_s3 + $0x18] sm:$0xff] %v554_v3  ;;  %636 = vst [vmem:[%s1332_s3 + $0xf8] sm:$0xff] %v582_v4  ;;  %v353_v7 = vadd.f32 %v1111_v36, %v352_v5  ;;  %v465_v8 = vadd.f32 %v1111_v36, %v464_v6 }
  0xf4   :  { %v760_v9 = vpop.f32.mrf.mxu0  ;;  %v816_v10 = vpop.f32.mrf.mxu1 }
  0xf5   :  { %v555_v11 = vmax.f32 %v353_v7, 0.0  ;;  %v583_v12 = vmax.f32 %v465_v8, 0.0 }
  0xf6   :  { %v355_v13 = vpop.f32.mrf.mxu0  ;;  %v467_v14 = vpop.f32.mrf.mxu1 }
  0xf7   :  { %609 = vst [vmem:[%s1332_s3 + $0x20] sm:$0xff] %v555_v11  ;;  %637 = vst [vmem:[%s1332_s3 + $0x100] sm:$0xff] %v583_v12  ;;  %v356_v15 = vadd.f32 %v1111_v36, %v355_v13  ;;  %v468_v16 = vadd.f32 %v1111_v36, %v467_v14 }
  0xf8   :  { %v761_v17 = vpop.f32.mrf.mxu0  ;;  %v817_v18 = vpop.f32.mrf.mxu1 }
  0xf9   :  { %v556_v19 = vmax.f32 %v356_v15, 0.0  ;;  %v584_v20 = vmax.f32 %v468_v16, 0.0 }
  0xfa   :  { %v360_v21 = vpop.f32.mrf.mxu0  ;;  %v472_v22 = vpop.f32.mrf.mxu1 }
  0xfb   :  { %610 = vst [vmem:[%s1332_s3 + $0x28] sm:$0xff] %v556_v19  ;;  %638 = vst [vmem:[%s1332_s3 + $0x108] sm:$0xff] %v584_v20  ;;  %v361_v23 = vadd.f32 %v1111_v36, %v360_v21  ;;  %v473_v24 = vadd.f32 %v1111_v36, %v472_v22 }
  0xfc   :  { %v764_v25 = vpop.f32.mrf.mxu0  ;;  %v820_v26 = vpop.f32.mrf.mxu1 }
  0xfd   :  { %v557_v27 = vmax.f32 %v361_v23, 0.0  ;;  %v585_v28 = vmax.f32 %v473_v24, 0.0 }
  0xfe   :  { %v363_v29 = vpop.f32.mrf.mxu0  ;;  %v475_v30 = vpop.f32.mrf.mxu1 }
  0xff   :  { %611 = vst [vmem:[%s1332_s3 + $0x30] sm:$0xff] %v557_v27  ;;  %639 = vst [vmem:[%s1332_s3 + $0x110] sm:$0xff] %v585_v28  ;;  %v364_v31 = vadd.f32 %v1111_v36, %v363_v29  ;;  %v476_v32 = vadd.f32 %v1111_v36, %v475_v30 }
 0x100   :  { %v765_v33 = vpop.f32.mrf.mxu0  ;;  %v821_v34 = vpop.f32.mrf.mxu1 }
 0x101   :  { %v558_v35 = vmax.f32 %v364_v31, 0.0  ;;  %v586_v37 = vmax.f32 %v476_v32, 0.0 }
 0x102   :  { %v368_v38 = vpop.f32.mrf.mxu0  ;;  %v480_v39 = vpop.f32.mrf.mxu1 }
 0x103   :  { %612 = vst [vmem:[%s1332_s3 + $0x38] sm:$0xff] %v558_v35  ;;  %640 = vst [vmem:[%s1332_s3 + $0x118] sm:$0xff] %v586_v37  ;;  %v369_v40 = vadd.f32 %v1111_v36, %v368_v38  ;;  %v481_v41 = vadd.f32 %v1111_v36, %v480_v39 }
 0x104   :  { %v768_v42 = vpop.f32.mrf.mxu0  ;;  %v824_v43 = vpop.f32.mrf.mxu1 }
 0x105   :  { %v559_v44 = vmax.f32 %v369_v40, 0.0  ;;  %v587_v45 = vmax.f32 %v481_v41, 0.0 }
 0x106   :  { %v371_v46 = vpop.f32.mrf.mxu0  ;;  %v483_v47 = vpop.f32.mrf.mxu1 }
 0x107   :  { %613 = vst [vmem:[%s1332_s3 + $0x40] sm:$0xff] %v559_v44  ;;  %641 = vst [vmem:[%s1332_s3 + $0x120] sm:$0xff] %v587_v45  ;;  %v372_v48 = vadd.f32 %v1111_v36, %v371_v46  ;;  %v484_v49 = vadd.f32 %v1111_v36, %v483_v47 }
 0x108   :  { %v769_v50 = vpop.f32.mrf.mxu0  ;;  %v825_v51 = vpop.f32.mrf.mxu1 }
 0x109   :  { %v560_v52 = vmax.f32 %v372_v48, 0.0  ;;  %v588_v53 = vmax.f32 %v484_v49, 0.0 }
 0x10a   :  { %v376_v54 = vpop.f32.mrf.mxu0  ;;  %v488_v55 = vpop.f32.mrf.mxu1 }
 0x10b   :  { %614 = vst [vmem:[%s1332_s3 + $0x48] sm:$0xff] %v560_v52  ;;  %642 = vst [vmem:[%s1332_s3 + $0x128] sm:$0xff] %v588_v53  ;;  %v377_v56 = vadd.f32 %v1111_v36, %v376_v54  ;;  %v489_v57 = vadd.f32 %v1111_v36, %v488_v55 }
 0x10c   :  { %v772_v58 = vpop.f32.mrf.mxu0  ;;  %v828_v59 = vpop.f32.mrf.mxu1 }
 0x10d   :  { %v561_v60 = vmax.f32 %v377_v56, 0.0  ;;  %v589_v61 = vmax.f32 %v489_v57, 0.0 }
 0x10e   :  { %v379_v62 = vpop.f32.mrf.mxu0  ;;  %v491_v63 = vpop.f32.mrf.mxu1 }
 0x10f   :  { %615 = vst [vmem:[%s1332_s3 + $0x50] sm:$0xff] %v561_v60  ;;  %643 = vst [vmem:[%s1332_s3 + $0x130] sm:$0xff] %v589_v61  ;;  %v380_v0 = vadd.f32 %v1111_v36, %v379_v62  ;;  %v492_v1 = vadd.f32 %v1111_v36, %v491_v63 }
 0x110   :  { %v773_v2 = vpop.f32.mrf.mxu0  ;;  %v829_v3 = vpop.f32.mrf.mxu1 }
 0x111   :  { %v562_v4 = vmax.f32 %v380_v0, 0.0  ;;  %v590_v5 = vmax.f32 %v492_v1, 0.0 }
 0x112   :  { %v384_v6 = vpop.f32.mrf.mxu0  ;;  %v496_v7 = vpop.f32.mrf.mxu1 }
 0x113   :  { %616 = vst [vmem:[%s1332_s3 + $0x58] sm:$0xff] %v562_v4  ;;  %644 = vst [vmem:[%s1332_s3 + $0x138] sm:$0xff] %v590_v5  ;;  %v385_v8 = vadd.f32 %v1111_v36, %v384_v6  ;;  %v497_v9 = vadd.f32 %v1111_v36, %v496_v7 }
 0x114   :  { %v776_v10 = vpop.f32.mrf.mxu0  ;;  %v832_v11 = vpop.f32.mrf.mxu1 }
 0x115   :  { %v563_v12 = vmax.f32 %v385_v8, 0.0  ;;  %v591_v13 = vmax.f32 %v497_v9, 0.0 }
 0x116   :  { %v387_v14 = vpop.f32.mrf.mxu0  ;;  %v499_v15 = vpop.f32.mrf.mxu1 }
 0x117   :  { %617 = vst [vmem:[%s1332_s3 + $0x60] sm:$0xff] %v563_v12  ;;  %645 = vst [vmem:[%s1332_s3 + $0x140] sm:$0xff] %v591_v13  ;;  %v388_v16 = vadd.f32 %v1111_v36, %v387_v14  ;;  %v500_v17 = vadd.f32 %v1111_v36, %v499_v15 }
 0x118   :  { %v777_v18 = vpop.f32.mrf.mxu0  ;;  %v833_v19 = vpop.f32.mrf.mxu1 }
 0x119   :  { %v564_v20 = vmax.f32 %v388_v16, 0.0  ;;  %v592_v21 = vmax.f32 %v500_v17, 0.0 }
 0x11a   :  { %v392_v22 = vpop.f32.mrf.mxu0  ;;  %v504_v23 = vpop.f32.mrf.mxu1 }
 0x11b   :  { %618 = vst [vmem:[%s1332_s3 + $0x68] sm:$0xff] %v564_v20  ;;  %646 = vst [vmem:[%s1332_s3 + $0x148] sm:$0xff] %v592_v21  ;;  %v393_v24 = vadd.f32 %v1111_v36, %v392_v22  ;;  %v505_v25 = vadd.f32 %v1111_v36, %v504_v23 }
 0x11c   :  { %v780_v26 = vpop.f32.mrf.mxu0  ;;  %v836_v27 = vpop.f32.mrf.mxu1 }
 0x11d   :  { %v565_v28 = vmax.f32 %v393_v24, 0.0  ;;  %v593_v29 = vmax.f32 %v505_v25, 0.0 }
 0x11e   :  { %v395_v30 = vpop.f32.mrf.mxu0  ;;  %v507_v31 = vpop.f32.mrf.mxu1 }
 0x11f   :  { %619 = vst [vmem:[%s1332_s3 + $0x70] sm:$0xff] %v565_v28  ;;  %647 = vst [vmem:[%s1332_s3 + $0x150] sm:$0xff] %v593_v29  ;;  %v396_v32 = vadd.f32 %v1111_v36, %v395_v30  ;;  %v508_v33 = vadd.f32 %v1111_v36, %v507_v31 }
 0x120   :  { %v781_v34 = vpop.f32.mrf.mxu0  ;;  %v837_v35 = vpop.f32.mrf.mxu1 }
 0x121   :  { %v566_v37 = vmax.f32 %v396_v32, 0.0  ;;  %v594_v38 = vmax.f32 %v508_v33, 0.0 }
 0x122   :  { %v400_v39 = vpop.f32.mrf.mxu0  ;;  %v512_v40 = vpop.f32.mrf.mxu1 }
 0x123   :  { %620 = vst [vmem:[%s1332_s3 + $0x78] sm:$0xff] %v566_v37  ;;  %648 = vst [vmem:[%s1332_s3 + $0x158] sm:$0xff] %v594_v38  ;;  %v401_v41 = vadd.f32 %v1111_v36, %v400_v39  ;;  %v513_v42 = vadd.f32 %v1111_v36, %v512_v40 }
 0x124   :  { %v784_v43 = vpop.f32.mrf.mxu0  ;;  %v840_v44 = vpop.f32.mrf.mxu1 }
 0x125   :  { %v567_v45 = vmax.f32 %v401_v41, 0.0  ;;  %v595_v46 = vmax.f32 %v513_v42, 0.0 }
 0x126   :  { %v403_v47 = vpop.f32.mrf.mxu0  ;;  %v515_v48 = vpop.f32.mrf.mxu1 }
 0x127   :  { %621 = vst [vmem:[%s1332_s3 + $0x80] sm:$0xff] %v567_v45  ;;  %649 = vst [vmem:[%s1332_s3 + $0x160] sm:$0xff] %v595_v46  ;;  %v404_v49 = vadd.f32 %v1111_v36, %v403_v47  ;;  %v516_v50 = vadd.f32 %v1111_v36, %v515_v48 }
 0x128   :  { %v785_v51 = vpop.f32.mrf.mxu0  ;;  %v841_v52 = vpop.f32.mrf.mxu1 }
 0x129   :  { %v568_v53 = vmax.f32 %v404_v49, 0.0  ;;  %v596_v54 = vmax.f32 %v516_v50, 0.0 }
 0x12a   :  { %v408_v55 = vpop.f32.mrf.mxu0  ;;  %v520_v56 = vpop.f32.mrf.mxu1 }
 0x12b   :  { %622 = vst [vmem:[%s1332_s3 + $0x88] sm:$0xff] %v568_v53  ;;  %650 = vst [vmem:[%s1332_s3 + $0x168] sm:$0xff] %v596_v54  ;;  %v409_v57 = vadd.f32 %v1111_v36, %v408_v55  ;;  %v521_v58 = vadd.f32 %v1111_v36, %v520_v56 }
 0x12c   :  { %v788_v59 = vpop.f32.mrf.mxu0  ;;  %v844_v60 = vpop.f32.mrf.mxu1 }
 0x12d   :  { %v569_v61 = vmax.f32 %v409_v57, 0.0  ;;  %v597_v62 = vmax.f32 %v521_v58, 0.0 }
 0x12e   :  { %v411_v63 = vpop.f32.mrf.mxu0  ;;  %v523_v0 = vpop.f32.mrf.mxu1 }
 0x12f   :  { %623 = vst [vmem:[%s1332_s3 + $0x90] sm:$0xff] %v569_v61  ;;  %651 = vst [vmem:[%s1332_s3 + $0x170] sm:$0xff] %v597_v62  ;;  %v412_v1 = vadd.f32 %v1111_v36, %v411_v63  ;;  %v524_v2 = vadd.f32 %v1111_v36, %v523_v0 }
 0x130   :  { %v789_v3 = vpop.f32.mrf.mxu0  ;;  %v845_v4 = vpop.f32.mrf.mxu1 }
 0x131   :  { %v570_v5 = vmax.f32 %v412_v1, 0.0  ;;  %v598_v6 = vmax.f32 %v524_v2, 0.0 }
 0x132   :  { %v416_v7 = vpop.f32.mrf.mxu0  ;;  %v528_v8 = vpop.f32.mrf.mxu1 }
 0x133   :  { %624 = vst [vmem:[%s1332_s3 + $0x98] sm:$0xff] %v570_v5  ;;  %652 = vst [vmem:[%s1332_s3 + $0x178] sm:$0xff] %v598_v6  ;;  %v417_v9 = vadd.f32 %v1111_v36, %v416_v7  ;;  %v529_v10 = vadd.f32 %v1111_v36, %v528_v8 }
 0x134   :  { %v792_v11 = vpop.f32.mrf.mxu0  ;;  %v848_v12 = vpop.f32.mrf.mxu1 }
 0x135   :  { %v571_v13 = vmax.f32 %v417_v9, 0.0  ;;  %v599_v14 = vmax.f32 %v529_v10, 0.0 }
 0x136   :  { %v419_v15 = vpop.f32.mrf.mxu0  ;;  %v531_v16 = vpop.f32.mrf.mxu1 }
 0x137   :  { %625 = vst [vmem:[%s1332_s3 + $0xa0] sm:$0xff] %v571_v13  ;;  %653 = vst [vmem:[%s1332_s3 + $0x180] sm:$0xff] %v599_v14  ;;  %v420_v17 = vadd.f32 %v1111_v36, %v419_v15  ;;  %v532_v18 = vadd.f32 %v1111_v36, %v531_v16 }
 0x138   :  { %v793_v19 = vpop.f32.mrf.mxu0  ;;  %v849_v20 = vpop.f32.mrf.mxu1 }
 0x139   :  { %v572_v21 = vmax.f32 %v420_v17, 0.0  ;;  %v600_v22 = vmax.f32 %v532_v18, 0.0 }
 0x13a   :  { %v424_v23 = vpop.f32.mrf.mxu0  ;;  %v536_v24 = vpop.f32.mrf.mxu1 }
 0x13b   :  { %626 = vst [vmem:[%s1332_s3 + $0xa8] sm:$0xff] %v572_v21  ;;  %654 = vst [vmem:[%s1332_s3 + $0x188] sm:$0xff] %v600_v22  ;;  %v425_v25 = vadd.f32 %v1111_v36, %v424_v23  ;;  %v537_v26 = vadd.f32 %v1111_v36, %v536_v24 }
 0x13c   :  { %v796_v27 = vpop.f32.mrf.mxu0  ;;  %v852_v28 = vpop.f32.mrf.mxu1 }
 0x13d   :  { %v573_v29 = vmax.f32 %v425_v25, 0.0  ;;  %v601_v30 = vmax.f32 %v537_v26, 0.0 }
 0x13e   :  { %v427_v31 = vpop.f32.mrf.mxu0  ;;  %v539_v32 = vpop.f32.mrf.mxu1 }
 0x13f   :  { %627 = vst [vmem:[%s1332_s3 + $0xb0] sm:$0xff] %v573_v29  ;;  %655 = vst [vmem:[%s1332_s3 + $0x190] sm:$0xff] %v601_v30  ;;  %v428_v33 = vadd.f32 %v1111_v36, %v427_v31  ;;  %v540_v34 = vadd.f32 %v1111_v36, %v539_v32 }
 0x140   :  { %v797_v35 = vpop.f32.mrf.mxu0  ;;  %v853_v37 = vpop.f32.mrf.mxu1 }
 0x141   :  { %v574_v38 = vmax.f32 %v428_v33, 0.0  ;;  %v602_v39 = vmax.f32 %v540_v34, 0.0 }
 0x142   :  { %v432_v40 = vpop.f32.mrf.mxu0  ;;  %v544_v41 = vpop.f32.mrf.mxu1 }
 0x143   :  { %628 = vst [vmem:[%s1332_s3 + $0xb8] sm:$0xff] %v574_v38  ;;  %656 = vst [vmem:[%s1332_s3 + $0x198] sm:$0xff] %v602_v39  ;;  %v433_v42 = vadd.f32 %v1111_v36, %v432_v40  ;;  %v545_v43 = vadd.f32 %v1111_v36, %v544_v41 }
 0x144   :  { %v800_v44 = vpop.f32.mrf.mxu0  ;;  %v856_v45 = vpop.f32.mrf.mxu1 }
 0x145   :  { %v575_v46 = vmax.f32 %v433_v42, 0.0  ;;  %v603_v47 = vmax.f32 %v545_v43, 0.0 }
 0x146   :  { %v435_v48 = vpop.f32.mrf.mxu0  ;;  %v547_v49 = vpop.f32.mrf.mxu1 }
 0x147   :  { %629 = vst [vmem:[%s1332_s3 + $0xc0] sm:$0xff] %v575_v46  ;;  %657 = vst [vmem:[%s1332_s3 + $0x1a0] sm:$0xff] %v603_v47  ;;  %v436_v50 = vadd.f32 %v1111_v36, %v435_v48  ;;  %v548_v51 = vadd.f32 %v1111_v36, %v547_v49 }
 0x148   :  { %v801_v52 = vpop.f32.mrf.mxu0  ;;  %v857_v53 = vpop.f32.mrf.mxu1 }
 0x149   :  { %v576_v54 = vmax.f32 %v436_v50, 0.0  ;;  %v604_v55 = vmax.f32 %v548_v51, 0.0 }
 0x14a   :  { %v440_v56 = vpop.f32.mrf.mxu0 }
 0x14b   :  { %630 = vst [vmem:[%s1332_s3 + $0xc8] sm:$0xff] %v576_v54  ;;  %658 = vst [vmem:[%s1332_s3 + $0x1a8] sm:$0xff] %v604_v55  ;;  %v441_v57 = vadd.f32 %v1111_v36, %v440_v56 }
 0x14c   :  { %v804_v58 = vpop.f32.mrf.mxu0 }
 0x14d   :  { %v577_v59 = vmax.f32 %v441_v57, 0.0 }
 0x14e   :  { %v443_v60 = vpop.f32.mrf.mxu0 }
 0x14f   :  { %631 = vst [vmem:[%s1332_s3 + $0xd0] sm:$0xff] %v577_v59  ;;  %v444_v61 = vadd.f32 %v1111_v36, %v443_v60 }
 0x150   :  { %v805_v62 = vpop.f32.mrf.mxu0 }
 0x151   :  { %v578_v63 = vmax.f32 %v444_v61, 0.0 }
 0x153   :  { %632 = vst [vmem:[%s1332_s3 + $0xd8] sm:$0xff] %v578_v63 }

// kernel: cnn3d_forward.4
= control target key start
LH: loop header
LB: loop body
LE: loop exit
PB: predicated region body
PF: predicated region fallthrough
CT: control target
= control target key end

     0   :  { %v913_v36 = vmov 0.0   ;;  %vm914_vm0 = vmmov 0   ;;  %s1133_s1 = inlined_call_operand.vmem [shape: bf16[896,128], index: 1, kind: input, shape index: {}]   ;;  %s1134_s0 = inlined_call_operand.vmem [shape: bf16[16,896], index: 0, kind: input, shape index: {}]   ;;  %s1135_s2 = inlined_call_operand.vmem [shape: f32[1,128], index: 2, kind: input, shape index: {}]   ;;  %s1136_s3 = inlined_call_operand.vmem [shape: f32[16,128], index: 3, kind: output, shape index: {}]  }
   0x1   :  { %v847_v0 = vld [vmem:[%s1133_s1 + $0x78] sm:$0xff]   ;;  %v851_v4 = vld [vmem:[%s1133_s1 + $0x70] sm:$0xff]   ;;  %v855_v8 = vld [vmem:[%s1133_s1 + $0x68] sm:$0xff]  }
   0x2   :  { %v848_v1 = vld [vmem:[%s1133_s1 + $0xf8] sm:$0xff]   ;;  %750 = vmatprep.subr.bf16.mxu0 %v847_v0  ;;  %v852_v5 = vld [vmem:[%s1133_s1 + $0xf0] sm:$0xff]   ;;  %v856_v9 = vld [vmem:[%s1133_s1 + $0xe8] sm:$0xff]  }
   0x3   :  { %v849_v2 = vld [vmem:[%s1133_s1 + $0x38] sm:$0xff]   ;;  %772 = vmatprep.subr.bf16.mxu1 %v848_v1  ;;  %v853_v6 = vld [vmem:[%s1133_s1 + $0x30] sm:$0xff]   ;;  %v857_v10 = vld [vmem:[%s1133_s1 + $0x28] sm:$0xff]  }
   0x4   :  { %v850_v3 = vld [vmem:[%s1133_s1 + $0xb8] sm:$0xff]   ;;  %751 = vmatpush3.bf16.msra.mxu0 %v849_v2  ;;  %v854_v7 = vld [vmem:[%s1133_s1 + $0xb0] sm:$0xff]   ;;  %v858_v11 = vld [vmem:[%s1133_s1 + $0xa8] sm:$0xff]  }
   0x5   :  { %773 = vmatpush3.bf16.msra.mxu1 %v850_v3  ;;  %752 = vmatprep.subr.bf16.mxu0 %v851_v4  ;;  %v859_v12 = vld [vmem:[%s1133_s1 + $0x60] sm:$0xff]   ;;  %v863_v16 = vld [vmem:[%s1133_s1 + $0x58] sm:$0xff]   ;;  %v867_v20 = vld [vmem:[%s1133_s1 + $0x50] sm:$0xff]  }
   0x6   :  { %774 = vmatprep.subr.bf16.mxu1 %v852_v5  ;;  %v860_v13 = vld [vmem:[%s1133_s1 + $0xe0] sm:$0xff]   ;;  %v864_v17 = vld [vmem:[%s1133_s1 + $0xd8] sm:$0xff]   ;;  %v868_v21 = vld [vmem:[%s1133_s1 + $0xd0] sm:$0xff]  }
   0x7   :  { %v861_v14 = vld [vmem:[%s1133_s1 + $0x20] sm:$0xff]   ;;  %v865_v18 = vld [vmem:[%s1133_s1 + $0x18] sm:$0xff]   ;;  %v869_v22 = vld [vmem:[%s1133_s1 + $0x10] sm:$0xff]  }
   0x8   :  { %753 = vmatpush3.bf16.msra.mxu0 %v853_v6  ;;  %v862_v15 = vld [vmem:[%s1133_s1 + $0xa0] sm:$0xff]   ;;  %v866_v19 = vld [vmem:[%s1133_s1 + $0x98] sm:$0xff]   ;;  %v870_v23 = vld [vmem:[%s1133_s1 + $0x90] sm:$0xff]  }
   0x9   :  { %775 = vmatpush3.bf16.msra.mxu1 %v854_v7  ;;  %754 = vmatprep.subr.bf16.mxu0 %v855_v8  ;;  %v871_v24 = vld [vmem:[%s1133_s1 + $0x48] sm:$0xff]   ;;  %v875_v28 = vld [vmem:[%s1133_s1 + $0x40] sm:$0xff]   ;;  %v885_v37 = vld [vmem:[%s1133_s1 + $0x178] sm:$0xff]  }
   0xa   :  { %776 = vmatprep.subr.bf16.mxu1 %v856_v9  ;;  %v872_v25 = vld [vmem:[%s1133_s1 + $0xc8] sm:$0xff]   ;;  %v876_v29 = vld [vmem:[%s1133_s1 + $0xc0] sm:$0xff]   ;;  %v886_v38 = vld [vmem:[%s1133_s1 + $0x138] sm:$0xff]  }
   0xb   :  { %v873_v26 = vld [vmem:[%s1133_s1 + $0x8] sm:$0xff]   ;;  %v877_v30 = vld [vmem:[%s1133_s1] sm:$0xff]   ;;  %v887_v39 = vld [vmem:[%s1133_s1 + $0x1b8] sm:$0xff]  }
   0xc   :  { %755 = vmatpush3.bf16.msra.mxu0 %v857_v10  ;;  %v874_v27 = vld [vmem:[%s1133_s1 + $0x88] sm:$0xff]   ;;  %v878_v31 = vld [vmem:[%s1133_s1 + $0x80] sm:$0xff]   ;;  %v888_v40 = vld [vmem:[%s1133_s1 + $0x170] sm:$0xff]  }
   0xd   :  { %777 = vmatpush3.bf16.msra.mxu1 %v858_v11  ;;  %756 = vmatprep.subr.bf16.mxu0 %v859_v12  ;;  %v879_v32 = vld [vmem:[%s1134_s0] ss:$28 sps:$4 sm:$0xff]   ;;  %v882_v34 = vld [vmem:[%s1134_s0 + $0x8] ss:$28 sps:$4 sm:$0xff]   ;;  %v889_v41 = vld [vmem:[%s1133_s1 + $0x130] sm:$0xff]  }
   0xe   :  { %778 = vmatprep.subr.bf16.mxu1 %v860_v13  ;;  %v881_v33 = vld [vmem:[%s1134_s0 + $0x4] ss:$28 sps:$4 sm:$0xff]   ;;  %v884_v35 = vld [vmem:[%s1134_s0 + $0xc] ss:$28 sps:$4 sm:$0xff]   ;;  %v890_v42 = vld [vmem:[%s1133_s1 + $0x1b0] sm:$0xff]  }
   0xf   :  { %546 = vmatprep.mubr.bf16.mxu0 %v881_v33  ;;  %587 = vmatprep.mubr.bf16.mxu1 %v884_v35  ;;  %v891_v43 = vld [vmem:[%s1133_s1 + $0x168] sm:$0xff]   ;;  %v894_v46 = vld [vmem:[%s1133_s1 + $0x160] sm:$0xff]   ;;  %v897_v49 = vld [vmem:[%s1133_s1 + $0x158] sm:$0xff]  }
  0x10   :  { %757 = vmatpush3.bf16.msra.mxu0 %v861_v14  ;;  %v892_v44 = vld [vmem:[%s1133_s1 + $0x128] sm:$0xff]   ;;  %v895_v47 = vld [vmem:[%s1133_s1 + $0x120] sm:$0xff]   ;;  %v898_v50 = vld [vmem:[%s1133_s1 + $0x118] sm:$0xff]  }
  0x11   :  { %779 = vmatpush3.bf16.msra.mxu1 %v862_v15  ;;  %758 = vmatprep.subr.bf16.mxu0 %v863_v16  ;;  %v893_v45 = vld [vmem:[%s1133_s1 + $0x1a8] sm:$0xff]   ;;  %v896_v48 = vld [vmem:[%s1133_s1 + $0x1a0] sm:$0xff]   ;;  %v899_v51 = vld [vmem:[%s1133_s1 + $0x198] sm:$0xff]  }
  0x12   :  { %780 = vmatprep.subr.bf16.mxu1 %v864_v17  ;;  %v900_v52 = vld [vmem:[%s1133_s1 + $0x150] sm:$0xff]   ;;  %v903_v55 = vld [vmem:[%s1133_s1 + $0x148] sm:$0xff]   ;;  %v906_v58 = vld [vmem:[%s1133_s1 + $0x140] sm:$0xff]  }
  0x13   :  { %v901_v53 = vld [vmem:[%s1133_s1 + $0x110] sm:$0xff]   ;;  %v904_v56 = vld [vmem:[%s1133_s1 + $0x108] sm:$0xff]   ;;  %v907_v60 = vld [vmem:[%s1133_s1 + $0x100] sm:$0xff]  }
  0x14   :  { %759 = vmatpush3.bf16.msra.mxu0 %v865_v18  ;;  %v902_v54 = vld [vmem:[%s1133_s1 + $0x190] sm:$0xff]   ;;  %v905_v57 = vld [vmem:[%s1133_s1 + $0x188] sm:$0xff]   ;;  %v908_v61 = vld [vmem:[%s1133_s1 + $0x180] sm:$0xff]  }
  0x15   :  { %781 = vmatpush3.bf16.msra.mxu1 %v866_v19  ;;  %760 = vmatprep.subr.bf16.mxu0 %v867_v20  ;;  %v911_v59 = vld [vmem:[%s1134_s0 + $0x14] ss:$28 sps:$4 sm:$0xff]   ;;  %v686_v7 = vld [vmem:[%s1135_s2] ss:$0 sm:$0xff] }
  0x16   :  { %782 = vmatprep.subr.bf16.mxu1 %v868_v21  ;;  %v909_v62 = vld [vmem:[%s1134_s0 + $0x10] ss:$28 sps:$4 sm:$0xff]   ;;  %v912_v63 = vld [vmem:[%s1134_s0 + $0x18] ss:$28 sps:$4 sm:$0xff]  }
  0x18   :  { %761 = vmatpush3.bf16.msra.mxu0 %v869_v22 }
  0x19   :  { %783 = vmatpush3.bf16.msra.mxu1 %v870_v23  ;;  %762 = vmatprep.subr.bf16.mxu0 %v871_v24 }
  0x1a   :  { %784 = vmatprep.subr.bf16.mxu1 %v872_v25 }
  0x1c   :  { %763 = vmatpush3.bf16.msra.mxu0 %v873_v26 }
  0x1d   :  { %785 = vmatpush3.bf16.msra.mxu1 %v874_v27  ;;  %764 = vmatprep.subr.bf16.mxu0 %v875_v28 }
  0x1e   :  { %786 = vmatprep.subr.bf16.mxu1 %v876_v29 }
  0x20   :  { %765 = vmatpush3.bf16.msra.mxu0 %v877_v30 }
  0x21   :  { %787 = vmatpush3.bf16.msra.mxu1 %v878_v31  ;;  %794 = vmatprep.subr.bf16.mxu0 %v885_v37 }
  0x22   :  { %825 = vmatprep.subr.bf16.mxu1 %v913_v36 }
  0x23   :  { %547 = vmatmul.mubr.bf16.vlgmr.msra.gmra.mxu0 %v879_v32 }
  0x24   :  { %588 = vmatmul.mubr.bf16.vlgmr.msra.gmra.mxu1 %v882_v34  ;;  %795 = vmatpush3.bf16.msra.mxu0 %v886_v38 }
  0x25   :  { %841 = vmatprep.mubr.msk.bf16.mxu1 %vm914_vm0, %v913_v36  ;;  %826 = vmatpush3.bf16.msra.mxu1 %v887_v39 }
  0x26   :  { %796 = vmatprep.subr.bf16.mxu0 %v888_v40  ;;  %827 = vmatprep.subr.bf16.mxu1 %v913_v36 }
  0x27   :  { %628 = vmatprep.mubr.bf16.mxu0 %v911_v59 }
  0x28   :  { %797 = vmatpush3.bf16.msra.mxu0 %v889_v41 }
  0x29   :  { %828 = vmatpush3.bf16.msra.mxu1 %v890_v42  ;;  %798 = vmatprep.subr.bf16.mxu0 %v891_v43 }
  0x2a   :  { %829 = vmatprep.subr.bf16.mxu1 %v913_v36 }
  0x2c   :  { %799 = vmatpush3.bf16.msra.mxu0 %v892_v44 }
  0x2d   :  { %830 = vmatpush3.bf16.msra.mxu1 %v893_v45  ;;  %800 = vmatprep.subr.bf16.mxu0 %v894_v46 }
  0x2e   :  { %831 = vmatprep.subr.bf16.mxu1 %v913_v36 }
  0x30   :  { %801 = vmatpush3.bf16.msra.mxu0 %v895_v47 }
  0x31   :  { %832 = vmatpush3.bf16.msra.mxu1 %v896_v48  ;;  %802 = vmatprep.subr.bf16.mxu0 %v897_v49 }
  0x32   :  { %833 = vmatprep.subr.bf16.mxu1 %v913_v36 }
  0x34   :  { %803 = vmatpush3.bf16.msra.mxu0 %v898_v50 }
  0x35   :  { %834 = vmatpush3.bf16.msra.mxu1 %v899_v51  ;;  %804 = vmatprep.subr.bf16.mxu0 %v900_v52 }
  0x36   :  { %835 = vmatprep.subr.bf16.mxu1 %v913_v36 }
  0x38   :  { %805 = vmatpush3.bf16.msra.mxu0 %v901_v53 }
  0x39   :  { %836 = vmatpush3.bf16.msra.mxu1 %v902_v54  ;;  %806 = vmatprep.subr.bf16.mxu0 %v903_v55 }
  0x3a   :  { %837 = vmatprep.subr.bf16.mxu1 %v913_v36 }
  0x3c   :  { %807 = vmatpush3.bf16.msra.mxu0 %v904_v56 }
  0x3d   :  { %838 = vmatpush3.bf16.msra.mxu1 %v905_v57  ;;  %808 = vmatprep.subr.bf16.mxu0 %v906_v58 }
  0x3e   :  { %839 = vmatprep.subr.bf16.mxu1 %v913_v36 }
  0x40   :  { %809 = vmatpush3.bf16.msra.mxu0 %v907_v60 }
  0x41   :  { %840 = vmatpush3.bf16.msra.mxu1 %v908_v61 }
  0x43   :  { %629 = vmatmul.mubr.bf16.vlgmr.msra.gmra.mxu0 %v909_v62 }
  0x44   :  { %842 = vmatmul.mubr.bf16.vlgmr.msra.gmra.mxu1 %v912_v63 }
  0xe3   :  { %v766_v0 = vpop.f32.mrf.mxu0 }
  0xe4   :  { %v788_v1 = vpop.f32.mrf.mxu1 }
  0xe5   :  { %v767_v2 = vpop.f32.mrf.mxu0 }
  0xe6   :  { %v789_v3 = vpop.f32.mrf.mxu1  ;;  %v768_v5 = vadd.f32 %v767_v2, %v766_v0 }
  0xe7   :  { %v769_v4 = vpop.f32.mrf.mxu0  ;;  %v790_v10 = vadd.f32 %v789_v3, %v788_v1 }
  0xe8   :  { %v791_v6 = vpop.f32.mrf.mxu1  ;;  %v549_v9 = vadd.f32 %v768_v5, %v686_v7 }
  0xe9   :  { %v770_v8 = vpop.f32.mrf.mxu0 }
  0xea   :  { %v771_v11 = vadd.f32 %v770_v8, %v769_v4  ;;  %v792_v12 = vpop.f32.mrf.mxu1  ;;  %v590_v16 = vadd.f32 %v790_v10, %v549_v9 }
  0xeb   :  { %v793_v18 = vadd.f32 %v792_v12, %v791_v6 }
  0xec   :  { %v552_v17 = vadd.f32 %v771_v11, %v686_v7 }
  0xee   :  { %v593_v25 = vadd.f32 %v793_v18, %v552_v17 }
 0x103   :  { %v810_v13 = vpop.f32.mrf.mxu0 }
 0x104   :  { %v671_v14 = vpop.f32.mrf.mxu1 }
 0x105   :  { %v811_v15 = vpop.f32.mrf.mxu0 }
 0x106   :  { %v812_v19 = vadd.f32 %v811_v15, %v810_v13  ;;  %v843_v20 = vpop.f32.mrf.mxu1 }
 0x107   :  { %v813_v21 = vpop.f32.mrf.mxu0 }
 0x108   :  { %v631_v22 = vadd.f32 %v812_v19, %v590_v16  ;;  %v674_v23 = vpop.f32.mrf.mxu1 }
 0x109   :  { %v814_v24 = vpop.f32.mrf.mxu0 }
 0x10a   :  { %v672_v26 = vadd.f32 %v671_v14, %v631_v22  ;;  %v815_v27 = vadd.f32 %v814_v24, %v813_v21  ;;  %v844_v28 = vpop.f32.mrf.mxu1 }
 0x10c   :  { %v678_v29 = vmax.f32 %v672_v26, 0.0  ;;  %v634_v30 = vadd.f32 %v815_v27, %v593_v25 }
 0x10e   :  { %680 = vst [vmem:[%s1136_s3] sm:$0xff] %v678_v29  ;;  %v675_v31 = vadd.f32 %v674_v23, %v634_v30 }
 0x110   :  { %v679_v32 = vmax.f32 %v675_v31, 0.0 }
 0x112   :  { %681 = vst [vmem:[%s1136_s3 + $0x8] sm:$0xff] %v679_v32 }

// kernel: cnn3d_forward.5
= control target key start
LH: loop header
LB: loop body
LE: loop exit
PB: predicated region body
PF: predicated region fallthrough
CT: control target
= control target key end

     0   :  { %v765_v1 = vmov 0.0   ;;  %vm766_vm0 = vmmov 0   ;;  %s981_s1 = inlined_call_operand.vmem [shape: bf16[384,128], index: 1, kind: input, shape index: {}]   ;;  %s982_s0 = inlined_call_operand.vmem [shape: bf16[16,384], index: 0, kind: input, shape index: {}]   ;;  %s983_s3 = inlined_call_operand.vmem [shape: bf16[128,128], index: 3, kind: input, shape index: {}]   ;;  %s984_s5 = inlined_call_operand.vmem [shape: bf16[128,128], index: 5, kind: input, shape index: {}]   ;;  %s985_s2 = inlined_call_operand.vmem [shape: f32[1,128], index: 2, kind: input, shape index: {}]   ;;  %s986_s4 = inlined_call_operand.vmem [shape: f32[1,128], index: 4, kind: input, shape index: {}]   ;;  %s987_s6 = inlined_call_operand.vmem [shape: f32[1,128], index: 6, kind: input, shape index: {}]   ;;  %s988_s7 = inlined_call_operand.vmem [shape: f32[16,128], index: 7, kind: output, shape index: {}]  }
   0x1   :  { %v721_v0 = vld [vmem:[%s981_s1 + $0x78] sm:$0xff]   ;;  %659 = vmatprep.subr.bf16.mxu1 %v765_v1  ;;  %675 = vmatprep.mubr.msk.bf16.mxu1 %vm766_vm0, %v765_v1  ;;  %v724_v4 = vld [vmem:[%s981_s1 + $0x70] sm:$0xff]   ;;  %v727_v7 = vld [vmem:[%s981_s1 + $0x68] sm:$0xff]  }
   0x2   :  { %v722_v2 = vld [vmem:[%s981_s1 + $0x38] sm:$0xff]   ;;  %610 = vmatprep.subr.bf16.mxu0 %v721_v0  ;;  %v725_v5 = vld [vmem:[%s981_s1 + $0x30] sm:$0xff]   ;;  %v728_v8 = vld [vmem:[%s981_s1 + $0x28] sm:$0xff]  }
   0x3   :  { %v723_v3 = vld [vmem:[%s981_s1 + $0xb8] sm:$0xff]   ;;  %611 = vmatpush3.bf16.msra.mxu0 %v722_v2  ;;  %v726_v6 = vld [vmem:[%s981_s1 + $0xb0] sm:$0xff]   ;;  %v729_v9 = vld [vmem:[%s981_s1 + $0xa8] sm:$0xff]  }
   0x4   :  { %660 = vmatpush3.bf16.msra.mxu1 %v723_v3  ;;  %612 = vmatprep.subr.bf16.mxu0 %v724_v4  ;;  %v730_v10 = vld [vmem:[%s981_s1 + $0x60] sm:$0xff]   ;;  %v733_v13 = vld [vmem:[%s981_s1 + $0x58] sm:$0xff]   ;;  %v736_v16 = vld [vmem:[%s981_s1 + $0x50] sm:$0xff]  }
   0x5   :  { %661 = vmatprep.subr.bf16.mxu1 %v765_v1  ;;  %v731_v11 = vld [vmem:[%s981_s1 + $0x20] sm:$0xff]   ;;  %v734_v14 = vld [vmem:[%s981_s1 + $0x18] sm:$0xff]   ;;  %v737_v17 = vld [vmem:[%s981_s1 + $0x10] sm:$0xff]  }
   0x6   :  { %v732_v12 = vld [vmem:[%s981_s1 + $0xa0] sm:$0xff]   ;;  %v735_v15 = vld [vmem:[%s981_s1 + $0x98] sm:$0xff]   ;;  %v738_v18 = vld [vmem:[%s981_s1 + $0x90] sm:$0xff]  }
   0x7   :  { %613 = vmatpush3.bf16.msra.mxu0 %v725_v5  ;;  %v739_v19 = vld [vmem:[%s981_s1 + $0x48] sm:$0xff]   ;;  %v742_v22 = vld [vmem:[%s981_s1 + $0x40] sm:$0xff]   ;;  %v749_v28 = vld [vmem:[%s983_s3 + $0x38] sm:$0xff]  }
   0x8   :  { %662 = vmatpush3.bf16.msra.mxu1 %v726_v6  ;;  %614 = vmatprep.subr.bf16.mxu0 %v727_v7  ;;  %v740_v20 = vld [vmem:[%s981_s1 + $0x8] sm:$0xff]   ;;  %v747_v23 = vld [vmem:[%s982_s0 + $0x4] ss:$12 sps:$4 sm:$0xff]   ;;  %v753_v32 = vld [vmem:[%s983_s3 + $0x18] sm:$0xff]  }
   0x9   :  { %663 = vmatprep.subr.bf16.mxu1 %v765_v1  ;;  %v741_v21 = vld [vmem:[%s981_s1 + $0x88] sm:$0xff]   ;;  %v743_v24 = vld [vmem:[%s981_s1] sm:$0xff]   ;;  %278 = vmatprep.mubr.bf16.mxu0 %v747_v23  ;;  %v750_v29 = vld [vmem:[%s983_s3 + $0x30] sm:$0xff]  }
   0xa   :  { %v744_v25 = vld [vmem:[%s981_s1 + $0x80] sm:$0xff]   ;;  %v748_v27 = vld [vmem:[%s982_s0 + $0x8] ss:$12 sps:$4 sm:$0xff]   ;;  %v757_v36 = vld [vmem:[%s984_s5 + $0x38] sm:$0xff]  }
   0xb   :  { %615 = vmatpush3.bf16.msra.mxu0 %v728_v8  ;;  %v745_v26 = vld [vmem:[%s982_s0] ss:$12 sps:$4 sm:$0xff]   ;;  %v754_v33 = vld [vmem:[%s983_s3 + $0x10] sm:$0xff]   ;;  %v761_v40 = vld [vmem:[%s984_s5 + $0x18] sm:$0xff]  }
   0xc   :  { %664 = vmatpush3.bf16.msra.mxu1 %v729_v9  ;;  %616 = vmatprep.subr.bf16.mxu0 %v730_v10  ;;  %v751_v30 = vld [vmem:[%s983_s3 + $0x28] sm:$0xff]   ;;  %v752_v31 = vld [vmem:[%s983_s3 + $0x20] sm:$0xff]   ;;  %v758_v37 = vld [vmem:[%s984_s5 + $0x30] sm:$0xff]  }
   0xd   :  { %665 = vmatprep.subr.bf16.mxu1 %v765_v1  ;;  %v755_v34 = vld [vmem:[%s983_s3 + $0x8] sm:$0xff]   ;;  %v756_v35 = vld [vmem:[%s983_s3] sm:$0xff]   ;;  %v762_v59 = vld [vmem:[%s984_s5 + $0x10] sm:$0xff]  }
   0xe   :  { %v759_v38 = vld [vmem:[%s984_s5 + $0x28] sm:$0xff]   ;;  %v760_v39 = vld [vmem:[%s984_s5 + $0x20] sm:$0xff]  }
   0xf   :  { %617 = vmatpush3.bf16.msra.mxu0 %v731_v11  ;;  %v564_v43 = vld [vmem:[%s985_s2] ss:$0 sm:$0xff]  ;;  %v763_v60 = vld [vmem:[%s984_s5 + $0x8] sm:$0xff]  }
  0x10   :  { %666 = vmatpush3.bf16.msra.mxu1 %v732_v12  ;;  %618 = vmatprep.subr.bf16.mxu0 %v733_v13  ;;  %v764_v61 = vld [vmem:[%s984_s5] sm:$0xff]  }
  0x11   :  { %667 = vmatprep.subr.bf16.mxu1 %v765_v1  ;;  %v592_v62 = vld [vmem:[%s986_s4] ss:$0 sm:$0xff] }
  0x13   :  { %619 = vmatpush3.bf16.msra.mxu0 %v734_v14 }
  0x14   :  { %668 = vmatpush3.bf16.msra.mxu1 %v735_v15  ;;  %620 = vmatprep.subr.bf16.mxu0 %v736_v16 }
  0x15   :  { %669 = vmatprep.subr.bf16.mxu1 %v765_v1 }
  0x17   :  { %621 = vmatpush3.bf16.msra.mxu0 %v737_v17 }
  0x18   :  { %670 = vmatpush3.bf16.msra.mxu1 %v738_v18  ;;  %622 = vmatprep.subr.bf16.mxu0 %v739_v19 }
  0x19   :  { %671 = vmatprep.subr.bf16.mxu1 %v765_v1 }
  0x1b   :  { %623 = vmatpush3.bf16.msra.mxu0 %v740_v20 }
  0x1c   :  { %672 = vmatpush3.bf16.msra.mxu1 %v741_v21  ;;  %624 = vmatprep.subr.bf16.mxu0 %v742_v22 }
  0x1d   :  { %673 = vmatprep.subr.bf16.mxu1 %v765_v1 }
  0x1f   :  { %625 = vmatpush3.bf16.msra.mxu0 %v743_v24 }
  0x20   :  { %674 = vmatpush3.bf16.msra.mxu1 %v744_v25  ;;  %679 = vmatprep.subr.bf16.mxu0 %v765_v1 }
  0x21   :  { %699 = vmatprep.subr.bf16.mxu1 %v765_v1 }
  0x22   :  { %279 = vmatmul.mubr.bf16.vlgmr.msra.gmra.mxu0 %v745_v26 }
  0x23   :  { %676 = vmatmul.mubr.bf16.vlgmr.msra.gmra.mxu1 %v748_v27  ;;  %680 = vmatpush3.bf16.msra.mxu0 %v749_v28 }
  0x24   :  { %681 = vmatprep.subr.bf16.mxu0 %v765_v1  ;;  %695 = vmatprep.mubr.msk.bf16.mxu0 %vm766_vm0, %v765_v1 }
  0x25   :  { %715 = vmatprep.mubr.msk.bf16.mxu1 %vm766_vm0, %v765_v1  ;;  %700 = vmatpush3.bf16.msra.mxu1 %v757_v36 }
  0x26   :  { %701 = vmatprep.subr.bf16.mxu1 %v765_v1 }
  0x27   :  { %682 = vmatpush3.bf16.msra.mxu0 %v750_v29 }
  0x28   :  { %683 = vmatprep.subr.bf16.mxu0 %v765_v1 }
  0x29   :  { %702 = vmatpush3.bf16.msra.mxu1 %v758_v37 }
  0x2a   :  { %703 = vmatprep.subr.bf16.mxu1 %v765_v1 }
  0x2b   :  { %684 = vmatpush3.bf16.msra.mxu0 %v751_v30 }
  0x2c   :  { %685 = vmatprep.subr.bf16.mxu0 %v765_v1 }
  0x2d   :  { %704 = vmatpush3.bf16.msra.mxu1 %v759_v38 }
  0x2e   :  { %705 = vmatprep.subr.bf16.mxu1 %v765_v1 }
  0x2f   :  { %686 = vmatpush3.bf16.msra.mxu0 %v752_v31 }
  0x30   :  { %687 = vmatprep.subr.bf16.mxu0 %v765_v1 }
  0x31   :  { %706 = vmatpush3.bf16.msra.mxu1 %v760_v39 }
  0x32   :  { %707 = vmatprep.subr.bf16.mxu1 %v765_v1 }
  0x33   :  { %688 = vmatpush3.bf16.msra.mxu0 %v753_v32 }
  0x34   :  { %689 = vmatprep.subr.bf16.mxu0 %v765_v1 }
  0x35   :  { %708 = vmatpush3.bf16.msra.mxu1 %v761_v40 }
  0x36   :  { %709 = vmatprep.subr.bf16.mxu1 %v765_v1 }
  0x37   :  { %690 = vmatpush3.bf16.msra.mxu0 %v754_v33 }
  0x38   :  { %691 = vmatprep.subr.bf16.mxu0 %v765_v1 }
  0x39   :  { %710 = vmatpush3.bf16.msra.mxu1 %v762_v59 }
  0x3a   :  { %711 = vmatprep.subr.bf16.mxu1 %v765_v1 }
  0x3b   :  { %692 = vmatpush3.bf16.msra.mxu0 %v755_v34 }
  0x3c   :  { %693 = vmatprep.subr.bf16.mxu0 %v765_v1 }
  0x3d   :  { %712 = vmatpush3.bf16.msra.mxu1 %v763_v60 }
  0x3e   :  { %713 = vmatprep.subr.bf16.mxu1 %v765_v1  ;;  %v601_v1 = vld [vmem:[%s987_s6] ss:$0 sm:$0xff] }
  0x3f   :  { %694 = vmatpush3.bf16.msra.mxu0 %v756_v35 }
  0x41   :  { %714 = vmatpush3.bf16.msra.mxu1 %v764_v61 }
  0xe2   :  { %v626_v41 = vpop.f32.mrf.mxu0 }
  0xe3   :  { %v321_v42 = vpop.f32.mrf.mxu1 }
  0xe4   :  { %v627_v44 = vpop.f32.mrf.mxu0 }
  0xe5   :  { %v628_v45 = vadd.f32 %v627_v44, %v626_v41  ;;  %v677_v46 = vpop.f32.mrf.mxu1 }
  0xe6   :  { %v629_v47 = vpop.f32.mrf.mxu0 }
  0xe7   :  { %v281_v48 = vadd.f32 %v628_v45, %v564_v43  ;;  %v324_v49 = vpop.f32.mrf.mxu1 }
  0xe8   :  { %v630_v50 = vpop.f32.mrf.mxu0 }
  0xe9   :  { %v631_v51 = vadd.f32 %v630_v50, %v629_v47  ;;  %v678_v52 = vpop.f32.mrf.mxu1  ;;  %v322_v53 = vadd.f32 %v321_v42, %v281_v48 }
  0xeb   :  { %v284_v54 = vadd.f32 %v631_v51, %v564_v43  ;;  %v328_v56 = vmax.f32 %v322_v53, 0.0 }
  0xed   :  { %v325_v55 = vadd.f32 %v324_v49, %v284_v54 }
  0xef   :  { %v329_v57 = vmax.f32 %v325_v55, 0.0 }
  0xf1   :  { %v330_v58 = vpack.c.bf16 %v329_v57, %v328_v56 }
  0xf3   :  { %696 = vmatmul.mubr.bf16.vlgmr.msra.gmra.mxu0 %v330_v58 }
 0x1b3   :  { %v436_v63 = vpop.f32.mrf.mxu0 }
 0x1b4   :  { %v437_v2 = vadd.f32 %v592_v62, %v436_v63 }
 0x1b5   :  { %v697_v0 = vpop.f32.mrf.mxu0 }
 0x1b6   :  { %v443_v6 = vmax.f32 %v437_v2, 0.0 }
 0x1b7   :  { %v439_v3 = vpop.f32.mrf.mxu0 }
 0x1b8   :  { %v440_v4 = vadd.f32 %v592_v62, %v439_v3 }
 0x1b9   :  { %v698_v5 = vpop.f32.mrf.mxu0 }
 0x1ba   :  { %v444_v7 = vmax.f32 %v440_v4, 0.0 }
 0x1bc   :  { %v445_v8 = vpack.c.bf16 %v444_v7, %v443_v6 }
 0x1be   :  { %716 = vmatmul.mubr.bf16.vlgmr.msra.gmra.mxu1 %v445_v8 }
 0x27e   :  { %v551_v9 = vpop.f32.mrf.mxu1 }
 0x27f   :  { %v552_v10 = vadd.f32 %v601_v1, %v551_v9 }
 0x280   :  { %v717_v11 = vpop.f32.mrf.mxu1 }
 0x281   :  { %558 = vst [vmem:[%s988_s7] sm:$0xff] %v552_v10 }
 0x282   :  { %v554_v12 = vpop.f32.mrf.mxu1 }
 0x283   :  { %v555_v13 = vadd.f32 %v601_v1, %v554_v12 }
 0x284   :  { %v718_v14 = vpop.f32.mrf.mxu1 }
 0x285   :  { %559 = vst [vmem:[%s988_s7 + $0x8] sm:$0xff] %v555_v13 }

</bundles_post_ra>
